<compile_context>
chip_gen: v5e
topology: v5e:2x2
jax: 0.10.0
libtpu: 0.0.40
codegen_flags: <defaults>
</compile_context>

<pallas_src>
import functools

import jax
import jax.numpy as jnp
from jax import lax
from jax.experimental import pallas as pl
from jax.experimental.pallas import tpu as pltpu


def _round_up(x, m):
    return (x + m - 1) // m * m


def _pick_row_pack(gs, hw, sublanes):
    """Pick k so each group tile is (gs*k, hw/k): fill sublanes, keep lanes dense."""
    if gs >= sublanes:
        return 1
    target = -(-sublanes // gs)  # ceil(sublanes / gs)
    best = 1
    for k in range(2, target + 1):
        if hw % k:
            continue
        # Keep the lane dim a multiple of 128 (unless HW already isn't).
        if (hw // k) % 128 == 0 or hw % 128 != 0:
            best = k
    return best


def _pick_groups_per_block(num_groups, batch, group_bytes,
                           target_bytes=1 << 20, min_steps=8):
    """Largest divisor of num_groups whose block is <= ~1 MiB, keeping enough
    grid steps for megacore / pipeline occupancy."""
    divisors = [d for d in range(1, num_groups + 1) if num_groups % d == 0]
    fitting = [d for d in divisors if d * group_bytes <= target_bytes]
    gt = max(fitting) if fitting else 1
    while gt > 1 and batch * (num_groups // gt) < min_steps:
        gt = max(d for d in divisors if d < gt)
    return gt


def _group_norm_kernel(x_ref, w_ref, b_ref, o_ref, *, eps, groups_per_block):
    # x_ref / o_ref: (1, Gt, gs_eff, HW_eff)
    # w_ref / b_ref: (num_groups, gs_eff, 1)   -- VMEM-resident (constant block)
    gt, gs_eff, hw_eff = x_ref.shape[1], x_ref.shape[2], x_ref.shape[3]
    inv_n = 1.0 / float(gs_eff * hw_eff)

    x = x_ref[0].astype(jnp.float32)                     # (Gt, gs_eff, HW_eff)

    # Single stats sweep: per-group sum and sum-of-squares (f32).
    # Lane (XLU) reduction first, then sublane reduction.
    def _group_sum(v):
        return jnp.sum(jnp.sum(v, axis=2, keepdims=True), axis=1, keepdims=True)

    s = _group_sum(x)                                    # (Gt, 1, 1)
    ss = _group_sum(x * x)                               # (Gt, 1, 1)
    mean = s * inv_n
    var = jnp.maximum(ss * inv_n - mean * mean, 0.0)     # biased (unbiased=False)
    rstd = lax.rsqrt(var + eps)

    # Slice this step's Gt groups out of the resident weight/bias.
    g0 = pl.multiple_of(pl.program_id(1) * groups_per_block, groups_per_block)
    w = w_ref[pl.ds(g0, gt), :, :].astype(jnp.float32)   # (Gt, gs_eff, 1)
    b = b_ref[pl.ds(g0, gt), :, :].astype(jnp.float32)   # (Gt, gs_eff, 1)

    # Fused affine: out = x * scale + shift  (scale/shift lane-splat broadcast).
    scale = w * rstd                                     # (Gt, gs_eff, 1)
    shift = b - scale * mean                             # (Gt, gs_eff, 1)
    o_ref[0] = (x * scale + shift).astype(o_ref.dtype)


def group_norm_pallas(x, weight=None, bias=None, *, num_groups, eps=1e-5):
    """GroupNorm forward. x: (B, C, H, W); weight, bias: (C,) or None."""
    B, C, H, W = x.shape
    assert C % num_groups == 0, "num_groups must divide num_channels"
    gs = C // num_groups
    HW = H * W
    if weight is None:
        weight = jnp.ones((C,), x.dtype)
    if bias is None:
        bias = jnp.zeros((C,), x.dtype)

    itemsize = jnp.dtype(x.dtype).itemsize
    sublanes = {4: 8, 2: 16, 1: 32}.get(itemsize, 8)

    # Re-row small groups so the sublane dim is filled (layout plumbing only).
    k = _pick_row_pack(gs, HW, sublanes)
    gs_eff, hw_eff = gs * k, HW // k

    x4 = x.reshape(B, num_groups, gs_eff, hw_eff)

    wg = weight.reshape(num_groups, gs)
    bg = bias.reshape(num_groups, gs)
    if k > 1:
        # Each channel's rows were split into k consecutive rows -> repeat params.
        wg = jnp.repeat(wg, k, axis=1)
        bg = jnp.repeat(bg, k, axis=1)
    w3 = wg.reshape(num_groups, gs_eff, 1)
    b3 = bg.reshape(num_groups, gs_eff, 1)

    group_bytes = gs_eff * hw_eff * itemsize
    gt = _pick_groups_per_block(num_groups, B, group_bytes)
    block_bytes = gt * group_bytes

    # Derived VMEM budget: 2x double-buffered input + output blocks, resident
    # (padded) weight/bias, plus margin; capped for v7x headroom.
    wb_bytes = 2 * num_groups * _round_up(gs_eff, 8) * 128 * 4
    vmem_limit = int(min(48 << 20, max(4 * block_bytes + wb_bytes + (4 << 20),
                                       16 << 20)))

    kernel = functools.partial(_group_norm_kernel, eps=eps, groups_per_block=gt)

    out = pl.pallas_call(
        kernel,
        out_shape=jax.ShapeDtypeStruct((B, num_groups, gs_eff, hw_eff), x.dtype),
        grid_spec=pltpu.PrefetchScalarGridSpec(
            num_scalar_prefetch=0,
            grid=(B, num_groups // gt),
            in_specs=[
                pl.BlockSpec((1, gt, gs_eff, hw_eff), lambda b, g: (b, g, 0, 0)),
                pl.BlockSpec((num_groups, gs_eff, 1), lambda b, g: (0, 0, 0)),
                pl.BlockSpec((num_groups, gs_eff, 1), lambda b, g: (0, 0, 0)),
            ],
            out_specs=pl.BlockSpec((1, gt, gs_eff, hw_eff),
                                   lambda b, g: (b, g, 0, 0)),
        ),
        compiler_params=pltpu.CompilerParams(
            dimension_semantics=("parallel", "parallel"),
            vmem_limit_bytes=vmem_limit,
        ),
    )(x4, w3, b3)
    return out.reshape(B, C, H, W)


def group_norm_ref(x, weight, bias, *, num_groups, eps=1e-5):
    """Pure-JAX reference mirroring the PyTorch module's semantics."""
    B, C, H, W = x.shape
    gs = C // num_groups
    xg = x.reshape(B, num_groups, gs, H, W)
    mean = xg.mean(axis=(2, 3, 4), keepdims=True)
    var = ((xg - mean) ** 2).mean(axis=(2, 3, 4), keepdims=True)  # unbiased=False
    norm = (xg - mean) / jnp.sqrt(var + eps)
    norm = norm.reshape(B, C, H, W)
    return norm * weight[None, :, None, None] + bias[None, :, None, None]


if __name__ == "__main__":
    # Small shapes consistent with the module: b c h w, num_groups | num_channels
    B, C, H, W = 2, 4, 16, 16
    NUM_GROUPS = 2

    key = jax.random.PRNGKey(0)
    kx, kw, kb = jax.random.split(key, 3)

    x = jax.random.normal(kx, (B, C, H, W), dtype=jnp.float32)
    # Module __init__ uses ones/zeros; perturb deterministically so the affine
    # path is actually exercised.
    weight = jnp.ones((C,), jnp.float32) + 0.1 * jax.random.normal(kw, (C,), jnp.float32)
    bias = jnp.zeros((C,), jnp.float32) + 0.1 * jax.random.normal(kb, (C,), jnp.float32)

    out = group_norm_pallas(x, weight, bias, num_groups=NUM_GROUPS, eps=1e-5)
    out = jax.block_until_ready(out)

    ref = group_norm_ref(x, weight, bias, num_groups=NUM_GROUPS, eps=1e-5)
    assert out.shape == (B, C, H, W) and out.dtype == x.dtype
    # Slightly relaxed atol: kernel uses a fused sum/sumsq variance (single
    # stats sweep) vs. the centered-variance reference.
    assert jnp.allclose(out, ref, atol=5e-5, rtol=1e-5), "mismatch vs reference"

    print("KERNEL_OK")
</pallas_src>

<mosaic_0001>
module attributes {stable_mosaic.version = 11 : i64} {
  func.func @_group_norm_kernel(%arg0: i32, %arg1: i32, %arg2: memref<1x1x4x128xf32, #tpu.memory_space<vmem>>, %arg3: memref<2x4x1xf32, #tpu.memory_space<vmem>>, %arg4: memref<2x4x1xf32, #tpu.memory_space<vmem>>, %arg5: memref<1x1x4x128xf32, #tpu.memory_space<vmem>>) attributes {dimension_semantics = [#tpu.dimension_semantics<parallel>, #tpu.dimension_semantics<parallel>], iteration_bounds = array<i64: 2, 2>, scalar_prefetch = 0 : i64, scratch_operands = 0 : i64, tpu.core_type = #tpu.core_type<tc>, window_params = [{transform_indices = @transform_0, window_bounds = array<i64: 1, 1, 4, 128>}, {pipeline_mode = #tpu.pipeline_mode<synchronous>, transform_indices = @transform_1, window_bounds = array<i64: 2, 4, 1>}, {pipeline_mode = #tpu.pipeline_mode<synchronous>, transform_indices = @transform_2, window_bounds = array<i64: 2, 4, 1>}, {transform_indices = @transform_3, window_bounds = array<i64: 1, 1, 4, 128>}]} {
    %c0 = arith.constant 0 : index
    %c0_0 = arith.constant 0 : index
    %c0_1 = arith.constant 0 : index
    %c0_2 = arith.constant 0 : index
    %0 = vector.load %arg2[%c0, %c0_0, %c0_1, %c0_2] : memref<1x1x4x128xf32, #tpu.memory_space<vmem>>, vector<1x1x4x128xf32>
    %1 = vector.shape_cast %0 : vector<1x1x4x128xf32> to vector<1x4x128xf32>
    %cst = arith.constant dense<0.000000e+00> : vector<1x4xf32>
    %2 = vector.multi_reduction <add>, %1, %cst [2] : vector<1x4x128xf32> to vector<1x4xf32>
    %3 = vector.shape_cast %2 : vector<1x4xf32> to vector<1x4x1xf32>
    %cst_3 = arith.constant dense<0.000000e+00> : vector<1x1xf32>
    %4 = vector.multi_reduction <add>, %3, %cst_3 [1] : vector<1x4x1xf32> to vector<1x1xf32>
    %5 = vector.shape_cast %4 : vector<1x1xf32> to vector<1x1x1xf32>
    %6 = arith.mulf %1, %1 : vector<1x4x128xf32>
    %cst_4 = arith.constant dense<0.000000e+00> : vector<1x4xf32>
    %7 = vector.multi_reduction <add>, %6, %cst_4 [2] : vector<1x4x128xf32> to vector<1x4xf32>
    %8 = vector.shape_cast %7 : vector<1x4xf32> to vector<1x4x1xf32>
    %cst_5 = arith.constant dense<0.000000e+00> : vector<1x1xf32>
    %9 = vector.multi_reduction <add>, %8, %cst_5 [1] : vector<1x4x1xf32> to vector<1x1xf32>
    %10 = vector.shape_cast %9 : vector<1x1xf32> to vector<1x1x1xf32>
    %cst_6 = arith.constant 0.001953125 : f32
    %11 = vector.broadcast %cst_6 : f32 to vector<1x1x1xf32>
    %12 = arith.mulf %5, %11 : vector<1x1x1xf32>
    %cst_7 = arith.constant 0.001953125 : f32
    %13 = vector.broadcast %cst_7 : f32 to vector<1x1x1xf32>
    %14 = arith.mulf %10, %13 : vector<1x1x1xf32>
    %15 = arith.mulf %12, %12 : vector<1x1x1xf32>
    %16 = arith.subf %14, %15 : vector<1x1x1xf32>
    %cst_8 = arith.constant 0.000000e+00 : f32
    %17 = vector.broadcast %cst_8 : f32 to vector<1x1x1xf32>
    %18 = arith.maximumf %16, %17 : vector<1x1x1xf32>
    %cst_9 = arith.constant 9.99999974E-6 : f32
    %19 = vector.broadcast %cst_9 : f32 to vector<1x1x1xf32>
    %20 = arith.addf %18, %19 : vector<1x1x1xf32>
    %21 = math.rsqrt %20 : vector<1x1x1xf32>
    %c1_i32 = arith.constant 1 : i32
    %22 = arith.muli %arg1, %c1_i32 : i32
    %23 = tpu.assume_multiple %22, 1 : i32
    %24 = arith.index_cast %23 : i32 to index
    %c0_10 = arith.constant 0 : index
    %c0_11 = arith.constant 0 : index
    %25 = vector.load %arg3[%24, %c0_10, %c0_11] : memref<2x4x1xf32, #tpu.memory_space<vmem>>, vector<1x4x1xf32>
    %26 = arith.index_cast %23 : i32 to index
    %c0_12 = arith.constant 0 : index
    %c0_13 = arith.constant 0 : index
    %27 = vector.load %arg4[%26, %c0_12, %c0_13] : memref<2x4x1xf32, #tpu.memory_space<vmem>>, vector<1x4x1xf32>
    %28 = vector.broadcast %21 : vector<1x1x1xf32> to vector<1x4x1xf32>
    %29 = arith.mulf %25, %28 : vector<1x4x1xf32>
    %30 = vector.broadcast %12 : vector<1x1x1xf32> to vector<1x4x1xf32>
    %31 = arith.mulf %29, %30 : vector<1x4x1xf32>
    %32 = arith.subf %27, %31 : vector<1x4x1xf32>
    %33 = vector.broadcast %29 : vector<1x4x1xf32> to vector<1x4x128xf32>
    %34 = arith.mulf %1, %33 : vector<1x4x128xf32>
    %35 = vector.broadcast %32 : vector<1x4x1xf32> to vector<1x4x128xf32>
    %36 = arith.addf %34, %35 : vector<1x4x128xf32>
    %c0_14 = arith.constant 0 : index
    %c0_15 = arith.constant 0 : index
    %c0_16 = arith.constant 0 : index
    %c0_17 = arith.constant 0 : index
    %37 = vector.load %arg5[%c0_14, %c0_15, %c0_16, %c0_17] : memref<1x1x4x128xf32, #tpu.memory_space<vmem>>, vector<1x1x4x128xf32>
    %38 = vector.shape_cast %37 : vector<1x1x4x128xf32> to vector<1x4x128xf32>
    %39 = vector.shape_cast %36 : vector<1x4x128xf32> to vector<1x1x4x128xf32>
    tpu.vector_store %arg5[%c0_14, %c0_15, %c0_16, %c0_17], %39 {strides = array<i32>} : memref<1x1x4x128xf32, #tpu.memory_space<vmem>>, vector<1x1x4x128xf32>,
    return
  }
  func.func @transform_0(%arg0: i32, %arg1: i32) -> (i32, i32, i32, i32) {
    %c0_i32 = arith.constant 0 : i32
    %c0_i32_0 = arith.constant 0 : i32
    %c0_i32_1 = arith.constant 0 : i32
    return %arg0, %arg1, %c0_i32, %c0_i32_0 : i32, i32, i32, i32
  }
  func.func @transform_1(%arg0: i32, %arg1: i32) -> (i32, i32, i32) {
    %c0_i32 = arith.constant 0 : i32
    %c0_i32_0 = arith.constant 0 : i32
    %c0_i32_1 = arith.constant 0 : i32
    %c0_i32_2 = arith.constant 0 : i32
    return %c0_i32, %c0_i32_0, %c0_i32_1 : i32, i32, i32
  }
  func.func @transform_2(%arg0: i32, %arg1: i32) -> (i32, i32, i32) {
    %c0_i32 = arith.constant 0 : i32
    %c0_i32_0 = arith.constant 0 : i32
    %c0_i32_1 = arith.constant 0 : i32
    %c0_i32_2 = arith.constant 0 : i32
    return %c0_i32, %c0_i32_0, %c0_i32_1 : i32, i32, i32
  }
  func.func @transform_3(%arg0: i32, %arg1: i32) -> (i32, i32, i32, i32) {
    %c0_i32 = arith.constant 0 : i32
    %c0_i32_0 = arith.constant 0 : i32
    %c0_i32_1 = arith.constant 0 : i32
    return %arg0, %arg1, %c0_i32, %c0_i32_0 : i32, i32, i32, i32
  }
}

</mosaic_0001>

<bundles_post_ra>
// kernel: tpu_custom_call.1
= control target key start
LH: loop header
LB: loop body
LE: loop exit
PB: predicated region body
PF: predicated region fallthrough
CT: control target
= control target key end

     0   :  { %8 = vsyncpa [#allocation3], 0  ;;  %s694_s0 = inlined_call_operand.vmem [shape: f32[2,2,4,128], index: 0, kind: input, shape index: {}]   ;;  %s695_s1 = inlined_call_operand.vmem [shape: f32[2,4,1], index: 1, kind: input, shape index: {}]   ;;  %s696_s2 = inlined_call_operand.vmem [shape: f32[2,4,1], index: 2, kind: input, shape index: {}]   ;;  %s697_s3 = inlined_call_operand.hbm [shape: f32[2,2,4,128], index: 3, kind: output, shape index: {}]  }
   0x1   :  { %10 = vsyncpa [#allocation3 + $0x1], 0  ;;  %s561_s12 = smov 0   ;;  %s563_s13 = smov 0  }
   0x2   :  { %s565_s14 = smov 0   ;;  %s567_s15 = smov 0  }
   0x3   :  { %s569_s16 = smov 0   ;;  %s571_s17 = smov 0  }
   0x4   :  { %s573_s18 = smov 0   ;;  %s575_s19 = smov 0  }
   0x5 LB: > { %s354_s20 = sadd.s32 4294967295, %s538_s19   ;;  %s355_s21 = sadd.s32 4294967294, %s538_s19   ;;  %s538_s19 = sphi %s575_s19, %s16_s19   ;;  %s534_s18 = sphi %s573_s18, %s706_s18   ;;  %s530_s17 = sphi %s571_s17, %s705_s17   ;;  %s526_s16 = sphi %s569_s16, %s704_s16   ;;  %s522_s15 = sphi %s567_s15, %s703_s15   ;;  %s518_s14 = sphi %s565_s14, %s702_s14   ;;  %s514_s13 = sphi %s563_s13, %s701_s13   ;;  %s510_s12 = sphi %s561_s12, %s700_s12  }
   0x6   : > { %s25_s22 = sadd.s32 1, %s530_s17  ;;  %s28_s23 = sadd.s32 1, %s534_s18 }
   0x7   : > { %p26_p0 = scmp.ge.s32.totalorder %s25_s22, 2  ;;  %p117_p1 = scmp.ne.s32.totalorder %s518_s14, %s514_s13 }
   0x8   : > { %p118_p2 = scmp.eq.s32.totalorder %s354_s20, 3  ;;  %p123_p5 = scmp.ne.s32.totalorder %s514_s13, %s510_s12 }
   0x9   : > { %s708_s22 = smov (%p26_p0, %s25_s22), 0  ;;  %s710_s23 = smov (!%p26_p0, %s28_s23), %s534_s18 }
   0xa   : > { %s103_s24 = ssub.s32 %s530_s17, %s708_s22  ;;  %p612_p3 = por %p118_p2, %p117_p1 }
   0xb   : > { %p30_p4 = scmp.ge.s32.totalorder %s710_s23, 2  ;;  %p124_p6 = scmp.eq.s32.totalorder %s355_s21, 3 }
   0xc   : > { %p358_p7 = scmp.ge.s32.totalorder %s538_s19, 1  ;;  %p159_p9 = scmp.lt.s32.totalorder %s538_s19, 5 }
   0xd   : > { %s712_s23 = smov (%p30_p4, %s710_s23), 0  ;;  %p621_p8 = por %p124_p6, %p123_p5 }
   0xe   : > { %s102_s27 = ssub.s32 %s534_s18, %s712_s23  ;;  %s107_s28 = sadd.s32 1, %s518_s14 }
   0xf   : > { %s104_s29 = sor.u32 %s103_s24, %s102_s27  ;;  %p160_p10 = pnand %p358_p7, %p159_p9 }
  0x10   : > { %p105_p11 = scmp.eq.s32.totalorder %s104_s29, 0  ;;  %p186_p12 = scmp.lt.s32.totalorder (!%p160_p10), %s526_s16, 1 }
  0x11   : > { %163 = sbr.rel (%p160_p10) target bundleno = 323 (0x143), region = 32  ;;  %p188_p13 = scmp.lt.s32.totalorder (!%p160_p10), %s522_s15, 1 }
  0x12   : > { %s630_s30 = scalar_select %p105_p11, %s518_s14, %s107_s28  }
  0x13   : > { %s362_s20 = sshll.u32 (!%p160_p10), %s522_s15, 2 }
  0x14   : > { %s234_s27 = scalar_lea.vmem (!%p160_p10), %s695_s1, %s362_s20 }
  0x16   : > { %s187_s4 = scalar_select %p186_p12, %s526_s16, 1  ;;  %vm195_vm0 = vcmask 1043456   ;;  %v540_v4 = vmov 0   ;;  %v235_v33 = vld [vmem:[%s234_s27] sm:$0xf] }
  0x17   : > { %s189_s5 = scalar_select %p188_p13, %s522_s15, 1  ;;  %440 = vset.pattern.permute.xlu1 %v540_v4  ;;  %441 = vset.pattern.permute.xlu0 %v540_v4 }
  0x18   : > { %s360_s6 = sshll.u32 %s187_s4, 1  ;;  %s236_s4 = scalar_lea.vmem %s696_s2, %s362_s20 }
  0x19   : > { %s191_s7 = sadd.s32 %s360_s6, %s189_s5  ;;  %v237_v37 = vld [vmem:[%s236_s4] sm:$0xf]  ;;  %s364_s5 = sshll.u32 %s526_s16, 1 }
  0x1a   : > { %s361_s8 = sshll.u32 %s191_s7, 2  ;;  %s183_s6 = sand.u32 1, %s514_s13  }
  0x1b   : > { %s193_s11 = scalar_lea.vmem %s694_s0, %s361_s8  ;;  %s265_s7 = sadd.s32 %s522_s15, %s364_s5 }
  0x1c   : > { %v194_v0 = vld [vmem:[%s193_s11] sm:$0xf]  ;;  %s359_s8 = sshll.u32 %s183_s6, 2  ;;  %s365_s9 = sshll.u32 %s265_s7, 2 }
  0x1d   : > { %v196_v1 = vsel %vm195_vm0, %v194_v0, 0.0  ;;  %v206_v2 = vmul.f32 %v194_v0, %v194_v0  ;;  %s267_s21 = scalar_lea.hbm %s697_s3, %s365_s9  ;;  %s185_s24 = scalar_lea.vmem [#allocation2], %s359_s8 }
  0x1e   : > { %197 = vadd.xlane.f32.xlu0 %v196_v1  ;;  %s269_s27 = sshll.u32 %s185_s24, 4  ;;  %s271_s28 = sshll.u32 %s267_s21, 4  ;;  %s270_s27 = int_to_ptr.vmem [resolvable:$true] %s269_s27  ;;  %s272_s28 = int_to_ptr.hbm [resolvable:$true] %s271_s28 }
  0x1f   : > { %v207_v3 = vsel %vm195_vm0, %v206_v2, 0.0  ;;  %s255_s16 = scalar_lea.sflag [#allocation3], %s183_s6  ;;  %s458_s20 = sshra.s32 %s272_s28, 4  ;;  %s459_s20 = int_to_ptr.hbm [resolvable:$true] %s458_s20 }
  0x20   : > { %s460_s15 = scalar_lea.hbm %s459_s20, 4  ;;  %s464_s5 = scalar_lea.hbm %s697_s3, 16 }
  0x21   : > { %p461_p0 = scmp.ne.s32.totalorder %s459_s20, %s460_s15  ;;  %p465_p4 = scmp.lt.s32.totalorder %s459_s20, %s697_s3 }
  0x22   : > { %p466_p5 = scmp.lt.s32.totalorder %s464_s5, %s460_s15 }
  0x23   : > { %p462_p1 = pnand %p461_p0, %p612_p3 }
  0x24   : > { %p467_p6 = por %p466_p5, %p465_p4 }
  0x25   : > { %p463_p2 = pneg %p462_p1 }
  0x26   : > { %208 = vadd.xlane.f32.xlu0 %v207_v3 }
  0x27   : > { %p468_p7 = pnand %p467_p6, %p463_p2 }
  0x91   : > { %v198_v5 = vpop.xlane.xlu0 %197 }
  0x92   : > { %v199_v6 = vsel %vm195_vm0, %v198_v5, 0.0 }
  0x93   : > { %v200_v7 = vrot.slane %v199_v6, 4 }
  0x95   : > { %v201_v8 = vadd.f32 %v200_v7, %v199_v6 }
  0x97   : > { %v202_v9 = vrot.slane %v201_v8, 2 }
  0x99   : > { %v203_v10 = vadd.f32 %v202_v9, %v201_v8  ;;  %v209_v11 = vpop.xlane.xlu0 %208 }
  0x9a   : > { %v210_v12 = vsel %vm195_vm0, %v209_v11, 0.0 }
  0x9b   : > { %v204_v13 = vrot.slane %v203_v10, 1  ;;  %v211_v14 = vrot.slane %v210_v12, 4 }
  0x9d   : > { %v212_v15 = vadd.f32 %v211_v14, %v210_v12  ;;  %v205_v16 = vadd.f32 %v204_v13, %v203_v10 }
  0x9f   : > { %v213_v17 = vrot.slane %v212_v15, 2  ;;  %v217_v20 = vmul.f32 0.001953125, %v205_v16 }
  0xa1   : > { %v214_v18 = vadd.f32 %v213_v17, %v212_v15  ;;  %v219_v23 = vmul.f32 %v217_v20, %v217_v20 }
  0xa3   : > { %v215_v19 = vrot.slane %v214_v18, 1 }
  0xa5   : > { %v216_v21 = vadd.f32 %v215_v19, %v214_v18 }
  0xa7   : > { %v218_v22 = vmul.f32 0.001953125, %v216_v21 }
  0xa9   : > { %v220_v24 = vsub.f32 %v218_v22, %v219_v23 }
  0xab   : > { %v221_v25 = vmax.f32 %v220_v24, 0.0 }
  0xad   : > { %v222_v26 = vadd.f32 1e-05, %v221_v25 }
  0xaf   : > { %442 = vrsqrt.f32 %v222_v26  ;;  %vm229_vm2 = vweird.f32 %v222_v26 }
  0xb5   : > { %v443_v27 = vpop.eup %442 }
  0xb6   : > { %v224_v28 = vmul.f32 %v443_v27, %v222_v26  ;;  %vm230_vm1 = vweird.f32 %v443_v27 }
  0xb7   : > { %vm231_vm3 = vmor %vm229_vm2, %vm230_vm1 }
  0xb8   : > { %v225_v29 = vmul.f32 %v443_v27, %v224_v28 }
  0xba   : > { %v226_v30 = vmul.f32 0.5, %v225_v29 }
  0xbc   : > { %v227_v31 = vsub.f32 1.5, %v226_v30 }
  0xbe   : > { %v228_v32 = vmul.f32 %v443_v27, %v227_v31 }
  0xc0   : > { %v232_v34 = vsel %vm231_vm3, %v443_v27, %v228_v32 }
  0xc1   : > { %v238_v35 = vmul.f32 %v235_v33, %v232_v34 }
  0xc3   : > { %243 = vperm.xlu1 %440, %v238_v35   ;;  %v239_v36 = vmul.f32 %v238_v35, %v217_v20 }
  0xc5   : > { %v240_v38 = vsub.f32 %v237_v37, %v239_v36 }
  0xcb   : > { %249 = vperm.xlu1 %440, %v240_v38  }
 0x135   : > { %v244_v39 = vpop.permute.xlu1 %243 }
 0x136   : > { %v246_v40 = vmul.f32 %v244_v39, %v194_v0 }
 0x13d   : > { %v250_v41 = vpop.permute.xlu1 %249 }
 0x13e   : > { %v252_v42 = vadd.f32 %v250_v41, %v246_v40 }
 0x140   : > { %253 = vst [vmem:[%s185_s24] sm:$0xf] %v252_v42 }
 0x141   : > { %471 = shalt.err (!%p468_p7)
}
 0x142   : > { %368 = dma.vmem_to_hbm [thread:$0]  (%p612_p3), %s270_s27, 64, %s272_s28, %s255_s16  }
 0x143 PF: > { %p374_p9 = scmp.ge.s32.totalorder %s538_s19, 2  ;;  %s283_s6 = sand.u32 1, %s510_s12  }
 0x144   : > { %s284_s9 = scalar_lea.sflag [#allocation3], %s283_s6 }
 0x145   : > { %p371_p10 = pnand %p374_p9, %p621_p8 }
 0x147   : > { %p372_p11 = pneg %p371_p10 }
 0x149   : > { %505 = dma.done.wait (%p372_p11), %s284_s9, 64  }
 0x14a   : > { %507 = vsyncadd (%p372_p11), %s284_s9, 4294967232  ;;  %s16_s19 = sadd.s32 1, %s538_s19   ;;  %s700_s12 = smov %s514_s13 }
 0x14b   : > { %p13_p12 = scmp.ge.s32.totalorder %s16_s19, 6   ;;  %s701_s13 = smov %s518_s14 }
 0x14c   : > { %s702_s14 = smov %s630_s30  ;;  %s703_s15 = smov %s530_s17 }
 0x14d   : > { %s704_s16 = smov %s534_s18  ;;  %s705_s17 = smov %s708_s22 }
 0x14e   : > { %s706_s18 = smov %s712_s23  ;;  %15 = sbr.rel (!%p13_p12) target bundleno = 5 (0x5), region = 69 }
 0x153   :  { %290 = vsyncpa [#allocation3], 1 }
 0x154   :  { %292 = vsyncpa [#allocation3 + $0x1], 1 }

</bundles_post_ra>
